<compile_context>
chip_gen: v7x
topology: tpu7x:2x2x1
jax: 0.10.0
libtpu: 0.0.40
codegen_flags: <defaults>
</compile_context>

<pallas_src>
import functools

import jax
import jax.numpy as jnp
from jax import lax
from jax.experimental import pallas as pl
from jax.experimental.pallas import tpu as pltpu

DIM = 20   # feature dim of the flow (module default)
K = 16     # number of stacked planar transforms (module default)
B = 8      # batch size for the example


def planar_flow_kernel(w_ref, uhatT_ref, at_ref, b_ref, wu_ref, zT_ref,
                       zoutT_ref, sldjT_ref):
    """All K planar transforms fused, one (D, B_TILE) batch tile per grid step.

    w_ref     : VMEM (K, D)   w vectors
    uhatT_ref : VMEM (D, K)   u_hat^T (reparameterized u)
    at_ref    : VMEM (K, K)   At[m, k] = w_m . u_hat_k   (loop-invariant)
    b_ref     : VMEM (K, 1)   biases
    wu_ref    : VMEM (K, 1)   w_k . u_hat_k              (loop-invariant)
    zT_ref    : VMEM (D, Bt)  input z^T  (batch on lanes)
    zoutT_ref : VMEM (D, Bt)  output z_K^T
    sldjT_ref : VMEM (1, Bt)  sum of log|det J| over the K transforms
    """
    zT = zT_ref[...].astype(jnp.float32)                  # (D, Bt)
    W = w_ref[...].astype(jnp.float32)                    # (K, D)
    At = at_ref[...].astype(jnp.float32)                  # (K, K)
    b_col = b_ref[...].astype(jnp.float32)                # (K, 1)
    wu_col = wu_ref[...].astype(jnp.float32)              # (K, 1)

    # acc[k, :] = w_k . z_0 + b_k  -- one MXU matmul replaces K VPU/XLU passes.
    acc = jnp.dot(W, zT, preferred_element_type=jnp.float32) + b_col   # (K, Bt)

    kk, bt = acc.shape
    row_ids = lax.broadcasted_iota(jnp.int32, (kk, bt), 0)
    H = jnp.zeros((kk, bt), jnp.float32)

    # Serial chain is now only a (K, Bt) recurrence (K static -> fully unrolled).
    for k in range(kk):
        h_k = jnp.tanh(acc[k:k + 1, :])                   # (1, Bt)  EUP
        H = jnp.where(row_ids == k, h_k, H)               # write row k of H
        acc = acc + At[:, k:k + 1] * h_k                  # feed h_k into rows m>k

    # z_K^T = z_0^T + U_hat^T @ H  -- second MXU matmul; lane-dense store.
    zoutT_ref[...] = (
        zT + jnp.dot(uhatT_ref[...].astype(jnp.float32), H,
                     preferred_element_type=jnp.float32)
    ).astype(zoutT_ref.dtype)

    # log|det J_k| = log(|1 + (1 - h_k^2) * (w_k . u_hat_k)| + 1e-8)
    det = 1.0 + (1.0 - H * H) * wu_col                    # (K, Bt)
    sldjT_ref[...] = jnp.sum(jnp.log(jnp.abs(det) + 1e-8),
                             axis=0, keepdims=True)       # (1, Bt) lane-dense


def _planar_flow_impl(z, w, u, b, b_tile):
    """z: (B, D); w, u: (K, D); b: (K,). Returns (z_K (B, D), SLDJ (B, 1))."""
    Bn, D = z.shape
    Kn = w.shape[0]

    # --- parameter preprocessing (glue, plain JAX): u_hat invertibility fix ---
    w = w.astype(jnp.float32)
    u = u.astype(jnp.float32)
    b = b.astype(jnp.float32)
    wtu = jnp.sum(w * u, axis=-1, keepdims=True)                      # (K, 1)
    u_hat = u + (-1.0 + jax.nn.softplus(wtu) - wtu) * w / jnp.sum(
        w * w, axis=-1, keepdims=True)

    # Loop-invariant quantities hoisted off the in-kernel serial chain.
    At = jnp.dot(w, u_hat.T)                               # (K, K): w_m . u_hat_k
    wu = jnp.sum(w * u_hat, axis=-1, keepdims=True)        # (K, 1): w_k . u_hat_k
    b_col = b[:, None]                                     # (K, 1)
    uhatT = u_hat.T                                        # (D, K)

    # Batch tiling: batch goes on the 128-lane axis (transposed working layout).
    if Bn <= b_tile:
        bt, Bp = Bn, Bn                                    # single full block
    else:
        bt = b_tile                                        # multiple of 128
        Bp = ((Bn + bt - 1) // bt) * bt

    z32 = z.astype(jnp.float32)
    if Bp != Bn:
        z32 = jnp.concatenate(
            [z32, jnp.zeros((Bp - Bn, D), jnp.float32)], axis=0)
    zT = z32.T                                             # (D, Bp)

    grid = (Bp // bt,)
    zoutT, sldjT = pl.pallas_call(
        planar_flow_kernel,
        out_shape=(
            jax.ShapeDtypeStruct((D, Bp), jnp.float32),
            jax.ShapeDtypeStruct((1, Bp), jnp.float32),
        ),
        grid_spec=pltpu.PrefetchScalarGridSpec(
            num_scalar_prefetch=0,
            grid=grid,
            in_specs=[
                pl.BlockSpec((Kn, D), lambda i: (0, 0)),   # W        (resident)
                pl.BlockSpec((D, Kn), lambda i: (0, 0)),   # U_hat^T  (resident)
                pl.BlockSpec((Kn, Kn), lambda i: (0, 0)),  # At       (resident)
                pl.BlockSpec((Kn, 1), lambda i: (0, 0)),   # b        (resident)
                pl.BlockSpec((Kn, 1), lambda i: (0, 0)),   # w.u_hat  (resident)
                pl.BlockSpec((D, bt), lambda i: (0, i)),   # z^T batch tile
            ],
            out_specs=(
                pl.BlockSpec((D, bt), lambda i: (0, i)),   # z_K^T tile
                pl.BlockSpec((1, bt), lambda i: (0, i)),   # sldj^T tile
            ),
        ),
        compiler_params=pltpu.CompilerParams(
            dimension_semantics=("parallel",)),
    )(w, uhatT, At, b_col, wu, zT)

    zK = zoutT[:, :Bn].T                                   # (B, D)
    sldj = sldjT[:, :Bn].T                                 # (B, 1)
    return zK, sldj


planar_flow = jax.jit(_planar_flow_impl, static_argnames=("b_tile",))


def planar_flow_ref(z, w, u, b):
    """Pure-JAX reference (sequential per-transform formulation)."""
    z = z.astype(jnp.float32)
    w = w.astype(jnp.float32)
    u = u.astype(jnp.float32)
    b = b.astype(jnp.float32)
    wtu = jnp.sum(w * u, axis=-1, keepdims=True)
    u_hat = u + (-1.0 + jax.nn.softplus(wtu) - wtu) * w / jnp.sum(
        w * w, axis=-1, keepdims=True)
    sldj = jnp.zeros((z.shape[0], 1), jnp.float32)
    for k in range(w.shape[0]):
        a = z @ w[k][:, None] + b[k]                       # (B, 1)
        h = jnp.tanh(a)
        z = z + u_hat[k][None, :] * h
        det = 1.0 + (1.0 - h * h) * jnp.sum(w[k] * u_hat[k])
        sldj = sldj + jnp.log(jnp.abs(det) + 1e-8)
    return z, sldj


if __name__ == "__main__":
    key = jax.random.PRNGKey(0)
    kz, kw, ku, kb = jax.random.split(key, 4)

    # Deterministic synthetic parameters (nn.Parameter(randn * 0.01) style init).
    z = jax.random.normal(kz, (B, DIM), dtype=jnp.float32)
    w = jax.random.normal(kw, (K, DIM), dtype=jnp.float32) * 0.01
    u = jax.random.normal(ku, (K, DIM), dtype=jnp.float32) * 0.01
    b = jax.random.normal(kb, (K,), dtype=jnp.float32) * 0.01

    # Small single-block path.
    zK, sldj = planar_flow(z, w, u, b, b_tile=1024)
    jax.block_until_ready((zK, sldj))
    zK_ref, sldj_ref = planar_flow_ref(z, w, u, b)
    assert jnp.allclose(zK, zK_ref, atol=1e-5, rtol=1e-4)
    assert jnp.allclose(sldj, sldj_ref, atol=1e-5, rtol=1e-4)

    # Gridded + padded path (grid > 1, ragged batch) to exercise the tiling.
    B2 = 200
    z2 = jax.random.normal(jax.random.PRNGKey(1), (B2, DIM), dtype=jnp.float32)
    zK2, sldj2 = planar_flow(z2, w, u, b, b_tile=128)
    jax.block_until_ready((zK2, sldj2))
    zK2_ref, sldj2_ref = planar_flow_ref(z2, w, u, b)
    assert jnp.allclose(zK2, zK2_ref, atol=1e-5, rtol=1e-4)
    assert jnp.allclose(sldj2, sldj2_ref, atol=1e-5, rtol=1e-4)

    print("KERNEL_OK")
</pallas_src>

<mosaic_0001>
module attributes {stable_mosaic.version = 11 : i64} {
  func.func @planar_flow_kernel(%arg0: i32, %arg1: memref<16x20xf32, #tpu.memory_space<vmem>>, %arg2: memref<20x16xf32, #tpu.memory_space<vmem>>, %arg3: memref<16x16xf32, #tpu.memory_space<vmem>>, %arg4: memref<16x1xf32, #tpu.memory_space<vmem>>, %arg5: memref<16x1xf32, #tpu.memory_space<vmem>>, %arg6: memref<20x8xf32, #tpu.memory_space<vmem>>, %arg7: memref<20x8xf32, #tpu.memory_space<vmem>>, %arg8: memref<1x8xf32, #tpu.memory_space<vmem>>) attributes {dimension_semantics = [#tpu.dimension_semantics<parallel>], iteration_bounds = array<i64: 1>, scalar_prefetch = 0 : i64, scratch_operands = 0 : i64, tpu.core_type = #tpu.core_type<tc>, window_params = [{pipeline_mode = #tpu.pipeline_mode<synchronous>, transform_indices = @transform_0, window_bounds = array<i64: 16, 20>}, {pipeline_mode = #tpu.pipeline_mode<synchronous>, transform_indices = @transform_1, window_bounds = array<i64: 20, 16>}, {pipeline_mode = #tpu.pipeline_mode<synchronous>, transform_indices = @transform_2, window_bounds = array<i64: 16, 16>}, {pipeline_mode = #tpu.pipeline_mode<synchronous>, transform_indices = @transform_3, window_bounds = array<i64: 16, 1>}, {pipeline_mode = #tpu.pipeline_mode<synchronous>, transform_indices = @transform_4, window_bounds = array<i64: 16, 1>}, {transform_indices = @transform_5, window_bounds = array<i64: 20, 8>}, {transform_indices = @transform_6, window_bounds = array<i64: 20, 8>}, {transform_indices = @transform_7, window_bounds = array<i64: 1, 8>}]} {
    %c0 = arith.constant 0 : index
    %c0_0 = arith.constant 0 : index
    %0 = vector.load %arg6[%c0, %c0_0] : memref<20x8xf32, #tpu.memory_space<vmem>>, vector<20x8xf32>
    %c0_1 = arith.constant 0 : index
    %c0_2 = arith.constant 0 : index
    %1 = vector.load %arg1[%c0_1, %c0_2] : memref<16x20xf32, #tpu.memory_space<vmem>>, vector<16x20xf32>
    %c0_3 = arith.constant 0 : index
    %c0_4 = arith.constant 0 : index
    %2 = vector.load %arg3[%c0_3, %c0_4] : memref<16x16xf32, #tpu.memory_space<vmem>>, vector<16x16xf32>
    %c0_5 = arith.constant 0 : index
    %c0_6 = arith.constant 0 : index
    %3 = vector.load %arg4[%c0_5, %c0_6] : memref<16x1xf32, #tpu.memory_space<vmem>>, vector<16x1xf32>
    %c0_7 = arith.constant 0 : index
    %c0_8 = arith.constant 0 : index
    %4 = vector.load %arg5[%c0_7, %c0_8] : memref<16x1xf32, #tpu.memory_space<vmem>>, vector<16x1xf32>
    %cst = arith.constant dense<0.000000e+00> : vector<16x8xf32>
    %5 = tpu.matmul %1, %0, %cst {dimension_numbers = #tpu.dot_dimension_numbers<[1], [0], [0], [1], [0, 0, 1, 1], [], []>} : vector<16x20xf32>, vector<20x8xf32>, vector<16x8xf32> -> vector<16x8xf32>
    %6 = vector.broadcast %3 : vector<16x1xf32> to vector<16x8xf32>
    %7 = arith.addf %5, %6 : vector<16x8xf32>
    %8 = tpu.iota {dimensions = array<i32: 0>} : vector<16x8xi32>
    %cst_9 = arith.constant 0.000000e+00 : f32
    %9 = vector.broadcast %cst_9 : f32 to vector<16x8xf32>
    %10 = vector.extract_strided_slice %7 {offsets = [0, 0], sizes = [1, 8], strides = [1, 1]} : vector<16x8xf32> to vector<1x8xf32>
    %11 = math.tanh %10 : vector<1x8xf32>
    %c0_i32 = arith.constant 0 : i32
    %12 = vector.broadcast %c0_i32 : i32 to vector<16x8xi32>
    %13 = arith.cmpi eq, %8, %12 : vector<16x8xi32>
    %14 = vector.shape_cast %11 : vector<1x8xf32> to vector<1x8xf32>
    %15 = vector.broadcast %14 : vector<1x8xf32> to vector<16x8xf32>
    %16 = arith.select %13, %15, %9 : vector<16x8xi1>, vector<16x8xf32>
    %17 = vector.extract_strided_slice %2 {offsets = [0, 0], sizes = [16, 1], strides = [1, 1]} : vector<16x16xf32> to vector<16x1xf32>
    %18 = vector.broadcast %17 : vector<16x1xf32> to vector<16x8xf32>
    %19 = vector.broadcast %11 : vector<1x8xf32> to vector<16x8xf32>
    %20 = arith.mulf %18, %19 : vector<16x8xf32>
    %21 = arith.addf %7, %20 : vector<16x8xf32>
    %22 = vector.extract_strided_slice %21 {offsets = [1, 0], sizes = [1, 8], strides = [1, 1]} : vector<16x8xf32> to vector<1x8xf32>
    %23 = math.tanh %22 : vector<1x8xf32>
    %c1_i32 = arith.constant 1 : i32
    %24 = vector.broadcast %c1_i32 : i32 to vector<16x8xi32>
    %25 = arith.cmpi eq, %8, %24 : vector<16x8xi32>
    %26 = vector.shape_cast %23 : vector<1x8xf32> to vector<1x8xf32>
    %27 = vector.broadcast %26 : vector<1x8xf32> to vector<16x8xf32>
    %28 = arith.select %25, %27, %16 : vector<16x8xi1>, vector<16x8xf32>
    %29 = vector.extract_strided_slice %2 {offsets = [0, 1], sizes = [16, 1], strides = [1, 1]} : vector<16x16xf32> to vector<16x1xf32>
    %30 = vector.broadcast %29 : vector<16x1xf32> to vector<16x8xf32>
    %31 = vector.broadcast %23 : vector<1x8xf32> to vector<16x8xf32>
    %32 = arith.mulf %30, %31 : vector<16x8xf32>
    %33 = arith.addf %21, %32 : vector<16x8xf32>
    %34 = vector.extract_strided_slice %33 {offsets = [2, 0], sizes = [1, 8], strides = [1, 1]} : vector<16x8xf32> to vector<1x8xf32>
    %35 = math.tanh %34 : vector<1x8xf32>
    %c2_i32 = arith.constant 2 : i32
    %36 = vector.broadcast %c2_i32 : i32 to vector<16x8xi32>
    %37 = arith.cmpi eq, %8, %36 : vector<16x8xi32>
    %38 = vector.shape_cast %35 : vector<1x8xf32> to vector<1x8xf32>
    %39 = vector.broadcast %38 : vector<1x8xf32> to vector<16x8xf32>
    %40 = arith.select %37, %39, %28 : vector<16x8xi1>, vector<16x8xf32>
    %41 = vector.extract_strided_slice %2 {offsets = [0, 2], sizes = [16, 1], strides = [1, 1]} : vector<16x16xf32> to vector<16x1xf32>
    %42 = vector.broadcast %41 : vector<16x1xf32> to vector<16x8xf32>
    %43 = vector.broadcast %35 : vector<1x8xf32> to vector<16x8xf32>
    %44 = arith.mulf %42, %43 : vector<16x8xf32>
    %45 = arith.addf %33, %44 : vector<16x8xf32>
    %46 = vector.extract_strided_slice %45 {offsets = [3, 0], sizes = [1, 8], strides = [1, 1]} : vector<16x8xf32> to vector<1x8xf32>
    %47 = math.tanh %46 : vector<1x8xf32>
    %c3_i32 = arith.constant 3 : i32
    %48 = vector.broadcast %c3_i32 : i32 to vector<16x8xi32>
    %49 = arith.cmpi eq, %8, %48 : vector<16x8xi32>
    %50 = vector.shape_cast %47 : vector<1x8xf32> to vector<1x8xf32>
    %51 = vector.broadcast %50 : vector<1x8xf32> to vector<16x8xf32>
    %52 = arith.select %49, %51, %40 : vector<16x8xi1>, vector<16x8xf32>
    %53 = vector.extract_strided_slice %2 {offsets = [0, 3], sizes = [16, 1], strides = [1, 1]} : vector<16x16xf32> to vector<16x1xf32>
    %54 = vector.broadcast %53 : vector<16x1xf32> to vector<16x8xf32>
    %55 = vector.broadcast %47 : vector<1x8xf32> to vector<16x8xf32>
    %56 = arith.mulf %54, %55 : vector<16x8xf32>
    %57 = arith.addf %45, %56 : vector<16x8xf32>
    %58 = vector.extract_strided_slice %57 {offsets = [4, 0], sizes = [1, 8], strides = [1, 1]} : vector<16x8xf32> to vector<1x8xf32>
    %59 = math.tanh %58 : vector<1x8xf32>
    %c4_i32 = arith.constant 4 : i32
    %60 = vector.broadcast %c4_i32 : i32 to vector<16x8xi32>
    %61 = arith.cmpi eq, %8, %60 : vector<16x8xi32>
    %62 = vector.shape_cast %59 : vector<1x8xf32> to vector<1x8xf32>
    %63 = vector.broadcast %62 : vector<1x8xf32> to vector<16x8xf32>
    %64 = arith.select %61, %63, %52 : vector<16x8xi1>, vector<16x8xf32>
    %65 = vector.extract_strided_slice %2 {offsets = [0, 4], sizes = [16, 1], strides = [1, 1]} : vector<16x16xf32> to vector<16x1xf32>
    %66 = vector.broadcast %65 : vector<16x1xf32> to vector<16x8xf32>
    %67 = vector.broadcast %59 : vector<1x8xf32> to vector<16x8xf32>
    %68 = arith.mulf %66, %67 : vector<16x8xf32>
    %69 = arith.addf %57, %68 : vector<16x8xf32>
    %70 = vector.extract_strided_slice %69 {offsets = [5, 0], sizes = [1, 8], strides = [1, 1]} : vector<16x8xf32> to vector<1x8xf32>
    %71 = math.tanh %70 : vector<1x8xf32>
    %c5_i32 = arith.constant 5 : i32
    %72 = vector.broadcast %c5_i32 : i32 to vector<16x8xi32>
    %73 = arith.cmpi eq, %8, %72 : vector<16x8xi32>
    %74 = vector.shape_cast %71 : vector<1x8xf32> to vector<1x8xf32>
    %75 = vector.broadcast %74 : vector<1x8xf32> to vector<16x8xf32>
    %76 = arith.select %73, %75, %64 : vector<16x8xi1>, vector<16x8xf32>
    %77 = vector.extract_strided_slice %2 {offsets = [0, 5], sizes = [16, 1], strides = [1, 1]} : vector<16x16xf32> to vector<16x1xf32>
    %78 = vector.broadcast %77 : vector<16x1xf32> to vector<16x8xf32>
    %79 = vector.broadcast %71 : vector<1x8xf32> to vector<16x8xf32>
    %80 = arith.mulf %78, %79 : vector<16x8xf32>
    %81 = arith.addf %69, %80 : vector<16x8xf32>
    %82 = vector.extract_strided_slice %81 {offsets = [6, 0], sizes = [1, 8], strides = [1, 1]} : vector<16x8xf32> to vector<1x8xf32>
    %83 = math.tanh %82 : vector<1x8xf32>
    %c6_i32 = arith.constant 6 : i32
    %84 = vector.broadcast %c6_i32 : i32 to vector<16x8xi32>
    %85 = arith.cmpi eq, %8, %84 : vector<16x8xi32>
    %86 = vector.shape_cast %83 : vector<1x8xf32> to vector<1x8xf32>
    %87 = vector.broadcast %86 : vector<1x8xf32> to vector<16x8xf32>
    %88 = arith.select %85, %87, %76 : vector<16x8xi1>, vector<16x8xf32>
    %89 = vector.extract_strided_slice %2 {offsets = [0, 6], sizes = [16, 1], strides = [1, 1]} : vector<16x16xf32> to vector<16x1xf32>
    %90 = vector.broadcast %89 : vector<16x1xf32> to vector<16x8xf32>
    %91 = vector.broadcast %83 : vector<1x8xf32> to vector<16x8xf32>
    %92 = arith.mulf %90, %91 : vector<16x8xf32>
    %93 = arith.addf %81, %92 : vector<16x8xf32>
    %94 = vector.extract_strided_slice %93 {offsets = [7, 0], sizes = [1, 8], strides = [1, 1]} : vector<16x8xf32> to vector<1x8xf32>
    %95 = math.tanh %94 : vector<1x8xf32>
    %c7_i32 = arith.constant 7 : i32
    %96 = vector.broadcast %c7_i32 : i32 to vector<16x8xi32>
    %97 = arith.cmpi eq, %8, %96 : vector<16x8xi32>
    %98 = vector.shape_cast %95 : vector<1x8xf32> to vector<1x8xf32>
    %99 = vector.broadcast %98 : vector<1x8xf32> to vector<16x8xf32>
    %100 = arith.select %97, %99, %88 : vector<16x8xi1>, vector<16x8xf32>
    %101 = vector.extract_strided_slice %2 {offsets = [0, 7], sizes = [16, 1], strides = [1, 1]} : vector<16x16xf32> to vector<16x1xf32>
    %102 = vector.broadcast %101 : vector<16x1xf32> to vector<16x8xf32>
    %103 = vector.broadcast %95 : vector<1x8xf32> to vector<16x8xf32>
    %104 = arith.mulf %102, %103 : vector<16x8xf32>
    %105 = arith.addf %93, %104 : vector<16x8xf32>
    %106 = vector.extract_strided_slice %105 {offsets = [8, 0], sizes = [1, 8], strides = [1, 1]} : vector<16x8xf32> to vector<1x8xf32>
    %107 = math.tanh %106 : vector<1x8xf32>
    %c8_i32 = arith.constant 8 : i32
    %108 = vector.broadcast %c8_i32 : i32 to vector<16x8xi32>
    %109 = arith.cmpi eq, %8, %108 : vector<16x8xi32>
    %110 = vector.shape_cast %107 : vector<1x8xf32> to vector<1x8xf32>
    %111 = vector.broadcast %110 : vector<1x8xf32> to vector<16x8xf32>
    %112 = arith.select %109, %111, %100 : vector<16x8xi1>, vector<16x8xf32>
    %113 = vector.extract_strided_slice %2 {offsets = [0, 8], sizes = [16, 1], strides = [1, 1]} : vector<16x16xf32> to vector<16x1xf32>
    %114 = vector.broadcast %113 : vector<16x1xf32> to vector<16x8xf32>
    %115 = vector.broadcast %107 : vector<1x8xf32> to vector<16x8xf32>
    %116 = arith.mulf %114, %115 : vector<16x8xf32>
    %117 = arith.addf %105, %116 : vector<16x8xf32>
    %118 = vector.extract_strided_slice %117 {offsets = [9, 0], sizes = [1, 8], strides = [1, 1]} : vector<16x8xf32> to vector<1x8xf32>
    %119 = math.tanh %118 : vector<1x8xf32>
    %c9_i32 = arith.constant 9 : i32
    %120 = vector.broadcast %c9_i32 : i32 to vector<16x8xi32>
    %121 = arith.cmpi eq, %8, %120 : vector<16x8xi32>
    %122 = vector.shape_cast %119 : vector<1x8xf32> to vector<1x8xf32>
    %123 = vector.broadcast %122 : vector<1x8xf32> to vector<16x8xf32>
    %124 = arith.select %121, %123, %112 : vector<16x8xi1>, vector<16x8xf32>
    %125 = vector.extract_strided_slice %2 {offsets = [0, 9], sizes = [16, 1], strides = [1, 1]} : vector<16x16xf32> to vector<16x1xf32>
    %126 = vector.broadcast %125 : vector<16x1xf32> to vector<16x8xf32>
    %127 = vector.broadcast %119 : vector<1x8xf32> to vector<16x8xf32>
    %128 = arith.mulf %126, %127 : vector<16x8xf32>
    %129 = arith.addf %117, %128 : vector<16x8xf32>
    %130 = vector.extract_strided_slice %129 {offsets = [10, 0], sizes = [1, 8], strides = [1, 1]} : vector<16x8xf32> to vector<1x8xf32>
    %131 = math.tanh %130 : vector<1x8xf32>
    %c10_i32 = arith.constant 10 : i32
    %132 = vector.broadcast %c10_i32 : i32 to vector<16x8xi32>
    %133 = arith.cmpi eq, %8, %132 : vector<16x8xi32>
    %134 = vector.shape_cast %131 : vector<1x8xf32> to vector<1x8xf32>
    %135 = vector.broadcast %134 : vector<1x8xf32> to vector<16x8xf32>
    %136 = arith.select %133, %135, %124 : vector<16x8xi1>, vector<16x8xf32>
    %137 = vector.extract_strided_slice %2 {offsets = [0, 10], sizes = [16, 1], strides = [1, 1]} : vector<16x16xf32> to vector<16x1xf32>
    %138 = vector.broadcast %137 : vector<16x1xf32> to vector<16x8xf32>
    %139 = vector.broadcast %131 : vector<1x8xf32> to vector<16x8xf32>
    %140 = arith.mulf %138, %139 : vector<16x8xf32>
    %141 = arith.addf %129, %140 : vector<16x8xf32>
    %142 = vector.extract_strided_slice %141 {offsets = [11, 0], sizes = [1, 8], strides = [1, 1]} : vector<16x8xf32> to vector<1x8xf32>
    %143 = math.tanh %142 : vector<1x8xf32>
    %c11_i32 = arith.constant 11 : i32
    %144 = vector.broadcast %c11_i32 : i32 to vector<16x8xi32>
    %145 = arith.cmpi eq, %8, %144 : vector<16x8xi32>
    %146 = vector.shape_cast %143 : vector<1x8xf32> to vector<1x8xf32>
    %147 = vector.broadcast %146 : vector<1x8xf32> to vector<16x8xf32>
    %148 = arith.select %145, %147, %136 : vector<16x8xi1>, vector<16x8xf32>
    %149 = vector.extract_strided_slice %2 {offsets = [0, 11], sizes = [16, 1], strides = [1, 1]} : vector<16x16xf32> to vector<16x1xf32>
    %150 = vector.broadcast %149 : vector<16x1xf32> to vector<16x8xf32>
    %151 = vector.broadcast %143 : vector<1x8xf32> to vector<16x8xf32>
    %152 = arith.mulf %150, %151 : vector<16x8xf32>
    %153 = arith.addf %141, %152 : vector<16x8xf32>
    %154 = vector.extract_strided_slice %153 {offsets = [12, 0], sizes = [1, 8], strides = [1, 1]} : vector<16x8xf32> to vector<1x8xf32>
    %155 = math.tanh %154 : vector<1x8xf32>
    %c12_i32 = arith.constant 12 : i32
    %156 = vector.broadcast %c12_i32 : i32 to vector<16x8xi32>
    %157 = arith.cmpi eq, %8, %156 : vector<16x8xi32>
    %158 = vector.shape_cast %155 : vector<1x8xf32> to vector<1x8xf32>
    %159 = vector.broadcast %158 : vector<1x8xf32> to vector<16x8xf32>
    %160 = arith.select %157, %159, %148 : vector<16x8xi1>, vector<16x8xf32>
    %161 = vector.extract_strided_slice %2 {offsets = [0, 12], sizes = [16, 1], strides = [1, 1]} : vector<16x16xf32> to vector<16x1xf32>
    %162 = vector.broadcast %161 : vector<16x1xf32> to vector<16x8xf32>
    %163 = vector.broadcast %155 : vector<1x8xf32> to vector<16x8xf32>
    %164 = arith.mulf %162, %163 : vector<16x8xf32>
    %165 = arith.addf %153, %164 : vector<16x8xf32>
    %166 = vector.extract_strided_slice %165 {offsets = [13, 0], sizes = [1, 8], strides = [1, 1]} : vector<16x8xf32> to vector<1x8xf32>
    %167 = math.tanh %166 : vector<1x8xf32>
    %c13_i32 = arith.constant 13 : i32
    %168 = vector.broadcast %c13_i32 : i32 to vector<16x8xi32>
    %169 = arith.cmpi eq, %8, %168 : vector<16x8xi32>
    %170 = vector.shape_cast %167 : vector<1x8xf32> to vector<1x8xf32>
    %171 = vector.broadcast %170 : vector<1x8xf32> to vector<16x8xf32>
    %172 = arith.select %169, %171, %160 : vector<16x8xi1>, vector<16x8xf32>
    %173 = vector.extract_strided_slice %2 {offsets = [0, 13], sizes = [16, 1], strides = [1, 1]} : vector<16x16xf32> to vector<16x1xf32>
    %174 = vector.broadcast %173 : vector<16x1xf32> to vector<16x8xf32>
    %175 = vector.broadcast %167 : vector<1x8xf32> to vector<16x8xf32>
    %176 = arith.mulf %174, %175 : vector<16x8xf32>
    %177 = arith.addf %165, %176 : vector<16x8xf32>
    %178 = vector.extract_strided_slice %177 {offsets = [14, 0], sizes = [1, 8], strides = [1, 1]} : vector<16x8xf32> to vector<1x8xf32>
    %179 = math.tanh %178 : vector<1x8xf32>
    %c14_i32 = arith.constant 14 : i32
    %180 = vector.broadcast %c14_i32 : i32 to vector<16x8xi32>
    %181 = arith.cmpi eq, %8, %180 : vector<16x8xi32>
    %182 = vector.shape_cast %179 : vector<1x8xf32> to vector<1x8xf32>
    %183 = vector.broadcast %182 : vector<1x8xf32> to vector<16x8xf32>
    %184 = arith.select %181, %183, %172 : vector<16x8xi1>, vector<16x8xf32>
    %185 = vector.extract_strided_slice %2 {offsets = [0, 14], sizes = [16, 1], strides = [1, 1]} : vector<16x16xf32> to vector<16x1xf32>
    %186 = vector.broadcast %185 : vector<16x1xf32> to vector<16x8xf32>
    %187 = vector.broadcast %179 : vector<1x8xf32> to vector<16x8xf32>
    %188 = arith.mulf %186, %187 : vector<16x8xf32>
    %189 = arith.addf %177, %188 : vector<16x8xf32>
    %190 = vector.extract_strided_slice %189 {offsets = [15, 0], sizes = [1, 8], strides = [1, 1]} : vector<16x8xf32> to vector<1x8xf32>
    %191 = math.tanh %190 : vector<1x8xf32>
    %c15_i32 = arith.constant 15 : i32
    %192 = vector.broadcast %c15_i32 : i32 to vector<16x8xi32>
    %193 = arith.cmpi eq, %8, %192 : vector<16x8xi32>
    %194 = vector.shape_cast %191 : vector<1x8xf32> to vector<1x8xf32>
    %195 = vector.broadcast %194 : vector<1x8xf32> to vector<16x8xf32>
    %196 = arith.select %193, %195, %184 : vector<16x8xi1>, vector<16x8xf32>
    %c0_10 = arith.constant 0 : index
    %c0_11 = arith.constant 0 : index
    %197 = vector.load %arg2[%c0_10, %c0_11] : memref<20x16xf32, #tpu.memory_space<vmem>>, vector<20x16xf32>
    %cst_12 = arith.constant dense<0.000000e+00> : vector<20x8xf32>
    %198 = tpu.matmul %197, %196, %cst_12 {dimension_numbers = #tpu.dot_dimension_numbers<[1], [0], [0], [1], [0, 0, 1, 1], [], []>} : vector<20x16xf32>, vector<16x8xf32>, vector<20x8xf32> -> vector<20x8xf32>
    %199 = arith.addf %0, %198 : vector<20x8xf32>
    %c0_13 = arith.constant 0 : index
    %c0_14 = arith.constant 0 : index
    %200 = vector.load %arg7[%c0_13, %c0_14] : memref<20x8xf32, #tpu.memory_space<vmem>>, vector<20x8xf32>
    tpu.vector_store %arg7[%c0_13, %c0_14], %199 {strides = array<i32>} : memref<20x8xf32, #tpu.memory_space<vmem>>, vector<20x8xf32>,
    %201 = arith.mulf %196, %196 : vector<16x8xf32>
    %cst_15 = arith.constant 1.000000e+00 : f32
    %202 = vector.broadcast %cst_15 : f32 to vector<16x8xf32>
    %203 = arith.subf %202, %201 : vector<16x8xf32>
    %204 = vector.broadcast %4 : vector<16x1xf32> to vector<16x8xf32>
    %205 = arith.mulf %203, %204 : vector<16x8xf32>
    %cst_16 = arith.constant 1.000000e+00 : f32
    %206 = vector.broadcast %cst_16 : f32 to vector<16x8xf32>
    %207 = arith.addf %206, %205 : vector<16x8xf32>
    %208 = math.absf %207 : vector<16x8xf32>
    %cst_17 = arith.constant 9.99999993E-9 : f32
    %209 = vector.broadcast %cst_17 : f32 to vector<16x8xf32>
    %210 = arith.addf %208, %209 : vector<16x8xf32>
    %211 = math.log %210 : vector<16x8xf32>
    %cst_18 = arith.constant dense<0.000000e+00> : vector<8xf32>
    %212 = vector.multi_reduction <add>, %211, %cst_18 [0] : vector<16x8xf32> to vector<8xf32>
    %213 = vector.shape_cast %212 : vector<8xf32> to vector<1x8xf32>
    %c0_19 = arith.constant 0 : index
    %c0_20 = arith.constant 0 : index
    %214 = vector.load %arg8[%c0_19, %c0_20] : memref<1x8xf32, #tpu.memory_space<vmem>>, vector<1x8xf32>
    tpu.vector_store %arg8[%c0_19, %c0_20], %213 {strides = array<i32>} : memref<1x8xf32, #tpu.memory_space<vmem>>, vector<1x8xf32>,
    return
  }
  func.func @transform_0(%arg0: i32) -> (i32, i32) {
    %c0_i32 = arith.constant 0 : i32
    %c0_i32_0 = arith.constant 0 : i32
    %c0_i32_1 = arith.constant 0 : i32
    return %c0_i32, %c0_i32_0 : i32, i32
  }
  func.func @transform_1(%arg0: i32) -> (i32, i32) {
    %c0_i32 = arith.constant 0 : i32
    %c0_i32_0 = arith.constant 0 : i32
    %c0_i32_1 = arith.constant 0 : i32
    return %c0_i32, %c0_i32_0 : i32, i32
  }
  func.func @transform_2(%arg0: i32) -> (i32, i32) {
    %c0_i32 = arith.constant 0 : i32
    %c0_i32_0 = arith.constant 0 : i32
    %c0_i32_1 = arith.constant 0 : i32
    return %c0_i32, %c0_i32_0 : i32, i32
  }
  func.func @transform_3(%arg0: i32) -> (i32, i32) {
    %c0_i32 = arith.constant 0 : i32
    %c0_i32_0 = arith.constant 0 : i32
    %c0_i32_1 = arith.constant 0 : i32
    return %c0_i32, %c0_i32_0 : i32, i32
  }
  func.func @transform_4(%arg0: i32) -> (i32, i32) {
    %c0_i32 = arith.constant 0 : i32
    %c0_i32_0 = arith.constant 0 : i32
    %c0_i32_1 = arith.constant 0 : i32
    return %c0_i32, %c0_i32_0 : i32, i32
  }
  func.func @transform_5(%arg0: i32) -> (i32, i32) {
    %c0_i32 = arith.constant 0 : i32
    %c0_i32_0 = arith.constant 0 : i32
    return %c0_i32, %arg0 : i32, i32
  }
  func.func @transform_6(%arg0: i32) -> (i32, i32) {
    %c0_i32 = arith.constant 0 : i32
    %c0_i32_0 = arith.constant 0 : i32
    return %c0_i32, %arg0 : i32, i32
  }
  func.func @transform_7(%arg0: i32) -> (i32, i32) {
    %c0_i32 = arith.constant 0 : i32
    %c0_i32_0 = arith.constant 0 : i32
    return %c0_i32, %arg0 : i32, i32
  }
}

</mosaic_0001>

<bundles_post_ra>
// kernel: _planar_flow_impl.1
= control target key start
LH: loop header
LB: loop body
LE: loop exit
PB: predicated region body
PF: predicated region fallthrough
CT: control target
= control target key end

     0   :  { %vm47_vm0 = vcmask 162816   ;;  %vm54_vm1 = vcmask 1043456   ;;  %v718_v6 = vmov 1   ;;  %s936_s0 = inlined_call_operand.vmem [shape: f32[16,20], index: 0, kind: input, shape index: {}]   ;;  %s937_s1 = inlined_call_operand.vmem [shape: f32[20,16], index: 1, kind: input, shape index: {}]   ;;  %s938_s2 = inlined_call_operand.vmem [shape: f32[16,16], index: 2, kind: input, shape index: {}]   ;;  %s939_s3 = inlined_call_operand.vmem [shape: f32[16,1], index: 3, kind: input, shape index: {}]   ;;  %s940_s4 = inlined_call_operand.vmem [shape: f32[16,1], index: 4, kind: input, shape index: {}]   ;;  %s941_s5 = inlined_call_operand.vmem [shape: f32[20,8], index: 5, kind: input, shape index: {}]   ;;  %s942_s6 = inlined_call_operand.vmem [shape: f32[20,8], index: 6, kind: output, shape index: {0}]   ;;  %s943_s7 = inlined_call_operand.hbm [shape: f32[1,8], index: 7, kind: output, shape index: {1}]  }
   0x1   :  { %v780_v0 = vld [vmem:[%s941_s5] sm:$0xff]  ;;  %v785_v1 = vld [vmem:[%s941_s5 + $0x8] sm:$0xff]  ;;  %v798_v5 = vld [vmem:[%s941_s5 + $0x10] sm:$0xf]  ;;  %635 = vset.pattern.permute.xlu1 %v718_v6 }
   0x2   :  { %v608_v2 = vpack.c.bf16 %v785_v1, %v780_v0  ;;  %v29_v3 = vld [vmem:[%s936_s0] sm:$0xff] }
   0x3   :  { %v31_v4 = vld [vmem:[%s938_s2] sm:$0xff]  ;;  %592 = vmatprep.mubr.msk.f32.mxu0 %vm47_vm0, %v29_v3 }
   0x4   :  { %v33_v7 = vld [vmem:[%s939_s3] sm:$0xff]  ;;  %609 = vmatprep.subr.bf16.mxu0 %v608_v2  ;;  %169 = vperm.xlu1 %635, %v31_v4  }
   0x5   :  { %13 = vsyncpa [#allocation3], 0  ;;  %611 = vmatpush3.bf16.msra.mxu0 %v608_v2  ;;  %v719_v8 = vmov 0   ;;  %v30_v9 = vld [vmem:[%s936_s0 + $0x8] sm:$0xff]  ;;  %v720_v10 = vmov 2   ;;  %v721_v11 = vmov 4   ;;  %v133_v33 = vlaneseq }
   0x6   :  { %634 = vset.pattern.permute.xlu0 %v719_v8  ;;  %590 = vmatprep.subr.msk.mxu0 %vm54_vm1, %v798_v5  ;;  %v722_v12 = vmov 3   ;;  %v723_v13 = vmov 5   ;;  %v724_v14 = vmov 6   ;;  %v34_v15 = vld [vmem:[%s939_s3 + $0x8] sm:$0xff]  ;;  %v725_v17 = vmov 8   ;;  %v35_v23 = vld [vmem:[%s940_s4] sm:$0xff] }
   0x7   :  { %39 = vperm.xlu0 %634, %v33_v7   ;;  %v32_v16 = vld [vmem:[%s938_s2 + $0x8] sm:$0xff]  ;;  %v726_v18 = vmov 9   ;;  %v727_v19 = vmov 11   ;;  %v728_v20 = vmov 12   ;;  %v729_v21 = vmov 14  }
   0x8   :  { %636 = vset.pattern.permute.xlu1 %v720_v10  ;;  %v730_v22 = vmov 7   ;;  %v731_v24 = vmov 10   ;;  %v732_v25 = vmov 13   ;;  %v829_v35 = vshrl.u32 %v133_v33, 7  ;;  %v36_v48 = vld [vmem:[%s940_s4 + $0x8] sm:$0xff] }
   0x9   :  { %591 = vmatpush3.msk.msra.mxu0 %vm54_vm1, %v798_v5  ;;  %190 = vperm.xlu1 %636, %v31_v4   ;;  %vm734_vm10 = vmmov 0  }
   0xa   :  { %593 = vmatmul.mubr.msk.f32.vlgmr.msra.gmra.mrb[0].mxu0 %vm47_vm0, %v30_v9  ;;  %v141_v37 = vsub.s32 0, %v829_v35  ;;  %v164_v50 = vsub.s32 1, %v829_v35  ;;  %vm137_vm2 = vcmp.eq.s32.totalorder %v829_v35, 0  ;;  %vm160_vm3 = vcmp.eq.s32.totalorder %v829_v35, 1 }
   0xb   :  { %147 = vperm.xlu0 %634, %v31_v4   ;;  %v185_v60 = vsub.s32 2, %v829_v35  ;;  %vm181_vm4 = vcmp.eq.s32.totalorder %v829_v35, 2  ;;  %vm202_vm5 = vcmp.eq.s32.totalorder %v829_v35, 3  ;;  %vm223_vm6 = vcmp.eq.s32.totalorder %v829_v35, 4 }
   0xc   :  { %vm244_vm7 = vcmp.eq.s32.totalorder %v829_v35, 5  ;;  %vm265_vm8 = vcmp.eq.s32.totalorder %v829_v35, 6  ;;  %vm286_vm9 = vcmp.eq.s32.totalorder %v829_v35, 7 }
   0xd   :  { %638 = vset.pattern.permute.xlu1 %v721_v11 }
   0xe   :  { %232 = vperm.xlu1 %638, %v31_v4  }
   0xf   :  { %637 = vset.pattern.permute.xlu0 %v722_v12 }
  0x10   :  { %211 = vperm.xlu0 %637, %v31_v4  }
  0x12   :  { %639 = vset.pattern.permute.xlu1 %v723_v13 }
  0x13   :  { %253 = vperm.xlu1 %639, %v31_v4  }
  0x14   :  { %640 = vset.pattern.permute.xlu0 %v724_v14 }
  0x15   :  { %274 = vperm.xlu0 %640, %v31_v4  }
  0x17   :  { %641 = vset.pattern.permute.xlu1 %v719_v8 }
  0x18   :  { %44 = vperm.xlu1 %641, %v34_v15  }
  0x19   :  { %642 = vset.pattern.permute.xlu0 %v718_v6 }
  0x1a   :  { %173 = vperm.xlu0 %642, %v32_v16  }
  0x1c   :  { %152 = vperm.xlu1 %641, %v32_v16  }
  0x1e   :  { %645 = vset.pattern.permute.xlu0 %v721_v11 }
  0x1f   :  { %236 = vperm.xlu0 %645, %v32_v16  }
  0x20   :  { %643 = vset.pattern.permute.xlu1 %v720_v10 }
  0x21   :  { %194 = vperm.xlu1 %643, %v32_v16  }
  0x23   :  { %648 = vset.pattern.permute.xlu0 %v730_v22 }
  0x24   :  { %295 = vperm.xlu0 %648, %v32_v16  }
  0x25   :  { %644 = vset.pattern.permute.xlu1 %v722_v12 }
  0x26   :  { %215 = vperm.xlu1 %644, %v32_v16  }
  0x28   :  { %651 = vset.pattern.permute.xlu0 %v731_v24 }
  0x29   :  { %340 = vperm.xlu0 %651, %v32_v16  }
  0x2a   :  { %646 = vset.pattern.permute.xlu1 %v723_v13 }
  0x2b   :  { %257 = vperm.xlu1 %646, %v32_v16  }
  0x2d   :  { %654 = vset.pattern.permute.xlu0 %v732_v25 }
  0x2e   :  { %385 = vperm.xlu0 %654, %v32_v16  }
  0x2f   :  { %647 = vset.pattern.permute.xlu1 %v724_v14 }
  0x30   :  { %278 = vperm.xlu1 %647, %v32_v16  }
  0x32   :  { %657 = vset.pattern.permute.xlu0 %v719_v8 }
  0x33   :  { %526 = vperm.xlu0 %657, %v36_v48  }
  0x34   :  { %649 = vset.pattern.permute.xlu1 %v725_v17  ;;  %v227_v17 = vsub.s32 4, %v829_v35 }
  0x35   :  { %310 = vperm.xlu1 %649, %v32_v16  }
  0x39   :  { %650 = vset.pattern.permute.xlu1 %v726_v18 }
  0x3a   :  { %325 = vperm.xlu1 %650, %v32_v16  }
  0x3e   :  { %652 = vset.pattern.permute.xlu1 %v727_v19 }
  0x3f   :  { %355 = vperm.xlu1 %652, %v32_v16  }
  0x43   :  { %653 = vset.pattern.permute.xlu1 %v728_v20 }
  0x44   :  { %370 = vperm.xlu1 %653, %v32_v16  }
  0x48   :  { %655 = vset.pattern.permute.xlu1 %v729_v21 }
  0x49   :  { %400 = vperm.xlu1 %655, %v32_v16  }
  0x4d   :  { %656 = vset.pattern.permute.xlu1 %v719_v8  ;;  %v206_v8 = vsub.s32 3, %v829_v35 }
  0x4e   :  { %521 = vperm.xlu1 %656, %v35_v23  }
  0x83   :  { %v170_v26 = vpop.permute.xlu1 %169 }
  0x86   :  { %v40_v30 = vpop.permute.xlu0 %39 }
  0x88   :  { %v191_v27 = vpop.permute.xlu1 %190 }
  0x8a   :  { %v148_v40 = vpop.permute.xlu0 %147 }
  0x8d   :  { %v825_v28 = vpop.permute.xlu1 %232 }
  0x8f   :  { %v212_v47 = vpop.permute.xlu0 %211 }
  0x92   :  { %v827_v34 = vpop.permute.xlu1 %253 }
  0x94   :  { %v837_v49 = vpop.permute.xlu0 %274 }
  0x97   :  { %v45_v36 = vpop.permute.xlu1 %44 }
  0x99   :  { %v174_v52 = vpop.permute.xlu0 %173 }
  0x9b   :  { %v153_v39 = vpop.permute.xlu1 %152 }
  0x9e   :  { %v237_v19 = vpop.permute.xlu0 %236 }
  0xa0   :  { %v195_v62 = vpop.permute.xlu1 %194 }
  0xa5   :  { %v216_v10 = vpop.permute.xlu1 %215 }
  0xdd   :  { %v594_v29 = vpop.f32.mrb[0].mxu0 }
  0xde   :  { %v124_v31 = vpop.f32.mrb[1].mxu0  ;;  %v130_v42 = vadd.f32 %v594_v29, %v45_v36  ;;  %v258_v29 = vpop.permute.xlu1 %257 }
  0xdf   :  { %v125_v32 = vadd.f32 %v124_v31, %v40_v30 }
  0xe1   :  { %658 = vtanh.f32 %v125_v32 }
  0xeb   :  { %v659_v38 = vpop.eup %658 }
  0xec   :  { %v142_v41 = vrot.slane %v659_v38, %v141_v37  ;;  %v269_v38 = vsub.s32 6, %v829_v35 }
  0xee   :  { %v155_v43 = vmul.f32 %v148_v40, %v142_v41  ;;  %v156_v44 = vmul.f32 %v153_v39, %v142_v41  ;;  %v143_v54 = vsel %vm137_vm2, %v142_v41, 0.0  ;;  %v279_v41 = vpop.permute.xlu1 %278 }
  0xf0   :  { %v157_v45 = vadd.f32 %v155_v43, %v125_v32  ;;  %v158_v46 = vadd.f32 %v156_v44, %v130_v42 }
  0xf2   :  { %660 = vtanh.f32 %v157_v45 }
  0xfc   :  { %v661_v51 = vpop.eup %660 }
  0xfd   :  { %v165_v53 = vrot.slane %v661_v51, %v164_v50  ;;  %v296_v51 = vpop.permute.xlu0 %295 }
  0xff   :  { %v176_v55 = vmul.f32 %v170_v26, %v165_v53  ;;  %v166_v56 = vsel %vm160_vm3, %v165_v53, %v143_v54  ;;  %v177_v57 = vmul.f32 %v174_v52, %v165_v53  ;;  %v248_v26 = vsub.s32 5, %v829_v35 }
 0x100   :  { %vm417_vm3 = vcmask 130048  }
 0x101   :  { %v178_v58 = vadd.f32 %v176_v55, %v157_v45  ;;  %v179_v59 = vadd.f32 %v177_v57, %v158_v46  ;;  %v290_v46 = vsub.s32 7, %v829_v35  ;;  %v735_v55 = vmov 0.0  }
 0x102   :  { %599 = vmatprep.mubr.msk.f32.mxu1 %vm734_vm10, %v735_v55 }
 0x103   :  { %662 = vtanh.f32 %v178_v58 }
 0x10d   :  { %v663_v61 = vpop.eup %662 }
 0x10e   :  { %v186_v63 = vrot.slane %v663_v61, %v185_v60 }
 0x110   :  { %v187_v2 = vsel %vm181_vm4, %v186_v63, %v166_v56  ;;  %v197_v3 = vmul.f32 %v191_v27, %v186_v63  ;;  %v198_v4 = vmul.f32 %v195_v62, %v186_v63  ;;  %v135_v62 = vadd.s32 8, %v829_v35  ;;  %v415_v35 = vld [vmem:[%s937_s1 + $0x8] sm:$0xff] }
 0x111   :  { %vm510_vm4 = vcmask 64512  }
 0x112   :  { %v199_v6 = vadd.f32 %v197_v3, %v178_v58  ;;  %v200_v7 = vadd.f32 %v198_v4, %v179_v59  ;;  %v311_v58 = vpop.permute.xlu1 %310  ;;  %vm302_vm11 = vcmp.eq.s32.totalorder %v135_v62, 8  ;;  %vm317_vm12 = vcmp.eq.s32.totalorder %v135_v62, 9 }
 0x113   :  { %vm332_vm13 = vcmp.eq.s32.totalorder %v135_v62, 10  ;;  %vm347_vm14 = vcmp.eq.s32.totalorder %v135_v62, 11  ;;  %vm362_vm15 = vcmp.eq.s32.totalorder %v135_v62, 12  ;;  %vm377_vm0 = vcmp.eq.s32.totalorder %v135_v62, 13 }
 0x114   :  { %664 = vtanh.f32 %v199_v6  ;;  %vm392_vm1 = vcmp.eq.s32.totalorder %v135_v62, 14  ;;  %vm407_vm2 = vcmp.eq.s32.totalorder %v135_v62, 15 }
 0x116   :  { %v326_v3 = vpop.permute.xlu1 %325 }
 0x11e   :  { %v665_v9 = vpop.eup %664 }
 0x11f   :  { %v207_v11 = vrot.slane %v665_v9, %v206_v8 }
 0x121   :  { %v208_v12 = vsel %vm202_vm5, %v207_v11, %v187_v2  ;;  %v218_v13 = vmul.f32 %v212_v47, %v207_v11  ;;  %v219_v14 = vmul.f32 %v216_v10, %v207_v11  ;;  %v733_v47 = vmov 0.0|0.0  }
 0x122   :  { %612 = vmatprep.subr.bf16.mxu1 %v733_v47  ;;  %vm550_vm5 = vcmask 57344  }
 0x123   :  { %v220_v15 = vadd.f32 %v218_v13, %v199_v6  ;;  %v221_v16 = vadd.f32 %v219_v14, %v200_v7 }
 0x125   :  { %666 = vtanh.f32 %v220_v15 }
 0x12f   :  { %v667_v18 = vpop.eup %666 }
 0x130   :  { %v228_v20 = vrot.slane %v667_v18, %v227_v17 }
 0x132   :  { %v239_v21 = vmul.f32 %v825_v28, %v228_v20  ;;  %v240_v22 = vmul.f32 %v237_v19, %v228_v20  ;;  %v229_v23 = vsel %vm223_vm6, %v228_v20, %v208_v12 }
 0x134   :  { %v241_v24 = vadd.f32 %v239_v21, %v220_v15  ;;  %v242_v25 = vadd.f32 %v240_v22, %v221_v16  ;;  %v356_v16 = vpop.permute.xlu1 %355 }
 0x136   :  { %668 = vtanh.f32 %v241_v24 }
 0x140   :  { %v669_v27 = vpop.eup %668 }
 0x141   :  { %v249_v30 = vrot.slane %v669_v27, %v248_v26 }
 0x143   :  { %v260_v31 = vmul.f32 %v827_v34, %v249_v30  ;;  %v261_v32 = vmul.f32 %v258_v29, %v249_v30  ;;  %v250_v33 = vsel %vm244_vm7, %v249_v30, %v229_v23 }
 0x145   :  { %v262_v36 = vadd.f32 %v260_v31, %v241_v24  ;;  %v263_v28 = vadd.f32 %v261_v32, %v242_v25 }
 0x147   :  { %670 = vtanh.f32 %v262_v36 }
 0x151   :  { %v671_v39 = vpop.eup %670 }
 0x152   :  { %v270_v40 = vrot.slane %v671_v39, %v269_v38 }
 0x154   :  { %v281_v42 = vmul.f32 %v837_v49, %v270_v40  ;;  %v282_v43 = vmul.f32 %v279_v41, %v270_v40  ;;  %v271_v44 = vsel %vm265_vm8, %v270_v40, %v250_v33 }
 0x156   :  { %v283_v45 = vadd.f32 %v281_v42, %v262_v36  ;;  %v284_v34 = vadd.f32 %v282_v43, %v263_v28 }
 0x158   :  { %672 = vtanh.f32 %v283_v45 }
 0x162   :  { %v673_v48 = vpop.eup %672 }
 0x163   :  { %v291_v52 = vrot.slane %v673_v48, %v290_v46 }
 0x165   :  { %v298_v53 = vmul.f32 %v296_v51, %v291_v52  ;;  %v871_v54 = vsel %vm286_vm9, %v291_v52, %v271_v44 }
 0x166   :  { %v515_v40 = vmul.f32 %v871_v54, %v871_v54 }
 0x167   :  { %v299_v49 = vadd.f32 %v298_v53, %v284_v34 }
 0x168   :  { %v517_v42 = vsub.f32 1.0, %v515_v40 }
 0x169   :  { %674 = vtanh.f32 %v299_v49 }
 0x173   :  { %v675_v56 = vpop.eup %674 }
 0x174   :  { %v306_v57 = vrot.slane %v675_v56, %v141_v37  ;;  %v341_v37 = vpop.permute.xlu0 %340 }
 0x176   :  { %v313_v59 = vmul.f32 %v311_v58, %v306_v57  ;;  %v308_v4 = vsel %vm302_vm11, %v306_v57, 0.0 }
 0x178   :  { %v314_v61 = vadd.f32 %v313_v59, %v299_v49  ;;  %v386_v29 = vpop.permute.xlu0 %385  ;;  %v414_v49 = vld [vmem:[%s937_s1] sm:$0xff]  ;;  %v416_v59 = vld [vmem:[%s937_s1 + $0x10] sm:$0xf]  ;;  %s736_s1 = smov [#allocation2]  }
 0x179   :  { %s560_s24 = sshll.u32 %s736_s1, 4  ;;  %s561_s24 = int_to_ptr.vmem [resolvable:$true] %s560_s24 }
 0x17a   :  { %676 = vtanh.f32 %v314_v61  ;;  %s694_s25 = scalar_lea.vmem %s561_s24, 16  ;;  %s698_s26 = scalar_lea.vmem %s561_s24, 32 }
 0x17b   :  { %p695_p0 = scmp.ne.s32.totalorder %s561_s24, %s694_s25  ;;  %p699_p1 = scmp.lt.s32.totalorder %s561_s24, %s561_s24 }
 0x17c   :  { %v527_v52 = vpop.permute.xlu0 %526  ;;  %p700_p2 = scmp.lt.s32.totalorder %s698_s26, %s694_s25 }
 0x17e   :  { %p701_p3 = por %p700_p2, %p699_p1 }
 0x180   :  { %p702_p4 = pnand %p701_p3, %p695_p0 }
 0x184   :  { %v677_v63 = vpop.eup %676 }
 0x185   :  { %v321_v2 = vrot.slane %v677_v63, %v164_v50 }
 0x187   :  { %v323_v6 = vsel %vm317_vm12, %v321_v2, %v308_v4  ;;  %v328_v7 = vmul.f32 %v326_v3, %v321_v2 }
 0x189   :  { %v329_v9 = vadd.f32 %v328_v7, %v314_v61 }
 0x18b   :  { %678 = vtanh.f32 %v329_v9 }
 0x195   :  { %v679_v10 = vpop.eup %678 }
 0x196   :  { %v336_v11 = vrot.slane %v679_v10, %v185_v60  ;;  %v371_v60 = vpop.permute.xlu1 %370 }
 0x198   :  { %v338_v12 = vsel %vm332_vm13, %v336_v11, %v323_v6  ;;  %v343_v13 = vmul.f32 %v341_v37, %v336_v11 }
 0x19a   :  { %v344_v14 = vadd.f32 %v343_v13, %v329_v9  ;;  %v401_v36 = vpop.permute.xlu1 %400 }
 0x19c   :  { %680 = vtanh.f32 %v344_v14 }
 0x19e   :  { %v522_v43 = vpop.permute.xlu1 %521 }
 0x1a6   :  { %v681_v15 = vpop.eup %680 }
 0x1a7   :  { %v351_v50 = vrot.slane %v681_v15, %v206_v8 }
 0x1a9   :  { %v353_v18 = vsel %vm347_vm14, %v351_v50, %v338_v12  ;;  %v358_v19 = vmul.f32 %v356_v16, %v351_v50 }
 0x1ab   :  { %v359_v20 = vadd.f32 %v358_v19, %v344_v14 }
 0x1ad   :  { %682 = vtanh.f32 %v359_v20 }
 0x1b7   :  { %v683_v21 = vpop.eup %682 }
 0x1b8   :  { %v366_v22 = vrot.slane %v683_v21, %v227_v17 }
 0x1ba   :  { %v373_v23 = vmul.f32 %v371_v60, %v366_v22  ;;  %v368_v24 = vsel %vm362_vm15, %v366_v22, %v353_v18 }
 0x1bc   :  { %v374_v25 = vadd.f32 %v373_v23, %v359_v20 }
 0x1be   :  { %684 = vtanh.f32 %v374_v25 }
 0x1c8   :  { %v685_v27 = vpop.eup %684 }
 0x1c9   :  { %v381_v8 = vrot.slane %v685_v27, %v248_v26  ;;  %v529_v26 = vmul.f32 %v522_v43, %v517_v42 }
 0x1cb   :  { %v388_v30 = vmul.f32 %v386_v29, %v381_v8  ;;  %v383_v31 = vsel %vm377_vm0, %v381_v8, %v368_v24  ;;  %v531_v45 = vadd.f32 1.0, %v529_v26 }
 0x1cd   :  { %v389_v32 = vadd.f32 %v388_v30, %v374_v25  ;;  %v533_v48 = vand.u32 2147483647, %v531_v45 }
 0x1cf   :  { %686 = vtanh.f32 %v389_v32  ;;  %v535_v56 = vadd.f32 1e-08, %v533_v48 }
 0x1d9   :  { %v687_v33 = vpop.eup %686 }
 0x1da   :  { %v396_v17 = vrot.slane %v687_v33, %v269_v38 }
 0x1dc   :  { %v403_v28 = vmul.f32 %v401_v36, %v396_v17  ;;  %v398_v39 = vsel %vm392_vm1, %v396_v17, %v383_v31 }
 0x1de   :  { %v404_v41 = vadd.f32 %v403_v28, %v389_v32 }
 0x1e0   :  { %688 = vtanh.f32 %v404_v41 }
 0x1e1   :  { %690 = vlog2.f32 %v535_v56 }
 0x1ea   :  { %v689_v44 = vpop.eup %688 }
 0x1eb   :  { %v411_v34 = vrot.slane %v689_v44, %v290_v46  ;;  %v691_v61 = vpop.eup %690 }
 0x1ec   :  { %v538_v62 = vmul.f32 0.6931472, %v691_v61 }
 0x1ed   :  { %v413_v47 = vsel %vm407_vm2, %v411_v34, %v398_v39 }
 0x1ee   :  { %v613_v38 = vpack.c.bf16 %v413_v47, %v871_v54  ;;  %v516_v51 = vmul.f32 %v413_v47, %v413_v47  ;;  %v541_v3 = vsel %vm510_vm4, %v538_v62, 0.0 }
 0x1f0   :  { %614 = vmatpush3.bf16.msra.mxu1 %v613_v38  ;;  %v518_v53 = vsub.f32 1.0, %v516_v51 }
 0x1f2   :  { %v530_v57 = vmul.f32 %v527_v52, %v518_v53 }
 0x1f3   :  { %600 = vmatmul.mubr.msk.f32.vlgmr.msra.gmra.mrb[0].mxu1 %vm417_vm3, %v414_v49 }
 0x1f4   :  { %v532_v58 = vadd.f32 1.0, %v530_v57  ;;  %602 = vmatprep.mubr.msk.f32.mxu1 %vm734_vm10, %v735_v55 }
 0x1f6   :  { %v534_v46 = vand.u32 2147483647, %v532_v58 }
 0x1f7   :  { %603 = vmatmul.mubr.msk.f32.gmra.mrb[2].mxu1 %vm417_vm3, %v415_v35 }
 0x1f8   :  { %v536_v54 = vadd.f32 1e-08, %v534_v46  ;;  %605 = vmatprep.mubr.msk.f32.mxu1 %vm734_vm10, %v735_v55 }
 0x1fa   :  { %692 = vlog2.f32 %v536_v54 }
 0x1fb   :  { %606 = vmatmul.mubr.msk.f32.gmra.mrb[4].mxu1 %vm417_vm3, %v416_v59 }
 0x204   :  { %v693_v63 = vpop.eup %692 }
 0x205   :  { %v540_v2 = vmul.f32 0.6931472, %v693_v63 }
 0x207   :  { %v542_v4 = vsel %vm510_vm4, %v540_v2, 0.0 }
 0x208   :  { %v543_v6 = vadd.f32 %v542_v4, %v541_v3 }
 0x20a   :  { %v544_v7 = vrot.slane %v543_v6, 4 }
 0x20c   :  { %v545_v9 = vadd.f32 %v544_v7, %v543_v6 }
 0x20e   :  { %v546_v10 = vrot.slane %v545_v9, 2 }
 0x210   :  { %v547_v55 = vadd.f32 %v546_v10, %v545_v9 }
 0x212   :  { %v548_v37 = vrot.slane %v547_v55, 1 }
 0x214   :  { %v549_v11 = vadd.f32 %v548_v37, %v547_v55 }
 0x216   :  { %551 = vst.msk [vmem:[#allocation2] sm:$0x1] %vm550_vm5, %v549_v11 }
 0x217   :  { %705 = shalt.err (!%p702_p4)
}
 0x218   :  { %s706_s29 = scalar_lea.hbm %s943_s7, 16 }
 0x219   :  { %p707_p5 = scmp.ne.s32.totalorder %s943_s7, %s706_s29  ;;  %p710_p6 = scmp.lt.u32.totalorder %s706_s29, %s943_s7 }
 0x21b   :  { %p712_p7 = pnand %p710_p6, %p707_p5 }
 0x21d   :  { %715 = shalt.err (!%p712_p7)
}
 0x21e   :  { %563 = dma.vmem_to_hbm [thread:$0]  %s561_s24, 16, %s943_s7, [#allocation3]   ;;  %vm513_vm6 = vcmask 60416  }
 0x2c6   :  { %v493_v12 = vpop.f32.mrb[0].mxu1 }
 0x2c7   :  { %v507_v13 = vadd.f32 %v493_v12, %v780_v0  ;;  %v601_v14 = vpop.f32.mrb[1].mxu1 }
 0x2c9   :  { %511 = vst.msk [vmem:[%s942_s6] sm:$0xff] %vm510_vm4, %v507_v13 }
 0x2ca   :  { %v498_v15 = vpop.f32.mrb[2].mxu1 }
 0x2cb   :  { %v508_v50 = vadd.f32 %v498_v15, %v785_v1  ;;  %v604_v16 = vpop.f32.mrb[3].mxu1 }
 0x2cd   :  { %512 = vst.msk [vmem:[%s942_s6 + $0x8] sm:$0xff] %vm510_vm4, %v508_v50 }
 0x2ce   :  { %v503_v18 = vpop.f32.mrb[4].mxu1 }
 0x2cf   :  { %v509_v19 = vadd.f32 %v503_v18, %v798_v5  ;;  %v607_v0 = vpop.f32.mrb[5].mxu1 }
 0x2d1   :  { %514 = vst.msk [vmem:[%s942_s6 + $0x10] sm:$0xf] %vm513_vm6, %v509_v19 }
 0x2d2   :  { %716 = dma.done.wait [#allocation3], 16  }
 0x2d3   :  { %717 = vsyncadd [#allocation3], 4294967280 }
 0x2d4   :  { %569 = vsyncpa [#allocation3], 1 }

</bundles_post_ra>
